<compile_context>
chip_gen: v6e
topology: v6e:2x2x1
jax: 0.10.0
libtpu: 0.0.40
codegen_flags: <defaults>
</compile_context>

<pallas_src>
from functools import partial

import jax
import jax.numpy as jnp
from jax.experimental import pallas as pl
from jax.experimental.pallas import tpu as pltpu


LN_EPS = 1e-5
LEAKY_SLOPE = 0.01
OUT_PAD = 128  # lane-dense output width (final layer padded from action_size to this)


def _round_up(v, m):
    return ((v + m - 1) // m) * m


def _linear(x_bf16, w_ref, b_ref):
    # bf16 MXU operands, f32 accumulation, f32 bias add ((1, F) lane-dense broadcast).
    return jnp.dot(x_bf16, w_ref[...], preferred_element_type=jnp.float32) + b_ref[...]


def _layernorm(h, g_ref, be_ref):
    mu = jnp.mean(h, axis=-1, keepdims=True)
    d = h - mu
    var = jnp.mean(d * d, axis=-1, keepdims=True)
    return d * jax.lax.rsqrt(var + LN_EPS) * g_ref[...] + be_ref[...]


def _leaky_relu(h):
    # slope < 1  =>  leaky_relu(h) == max(h, slope*h); mul + max on the VPU.
    return jnp.maximum(h, LEAKY_SLOPE * h)


def dqn_kernel(x_ref,
               w1_ref, b1_ref, g1_ref, be1_ref,
               w2_ref, b2_ref, g2_ref, be2_ref,
               w3_ref, b3_ref, g3_ref, be3_ref,
               w4_ref, b4_ref,
               o_ref):
    x = x_ref[...]  # bf16 [tb, S]

    # fc1 -> LayerNorm(256) -> LeakyReLU -> (dropout = identity in eval)
    h = _leaky_relu(_layernorm(_linear(x, w1_ref, b1_ref), g1_ref, be1_ref))
    # fc2 -> LayerNorm(128) -> LeakyReLU
    h = _leaky_relu(_layernorm(_linear(h.astype(jnp.bfloat16), w2_ref, b2_ref),
                               g2_ref, be2_ref))
    # fc3 -> LayerNorm(64) -> LeakyReLU
    h = _leaky_relu(_layernorm(_linear(h.astype(jnp.bfloat16), w3_ref, b3_ref),
                               g3_ref, be3_ref))
    # fc4 (padded to 128 output lanes; no norm / activation)
    o_ref[...] = _linear(h.astype(jnp.bfloat16), w4_ref, b4_ref).astype(o_ref.dtype)


@partial(jax.jit, static_argnames=("action_size", "batch_tile"))
def dqn_forward(x, params, action_size, *, batch_tile=None):
    B, S = x.shape
    assert params["w1"].shape[0] == S

    if batch_tile is None:
        # >= 2 grid steps whenever B >= 16, capped at 512 rows/tile
        # (sweep 256-2048 for production batch sizes).
        tb = min(512, _round_up(max(B // 2, 1), 8))
    else:
        tb = batch_tile
    assert tb % 8 == 0, "batch_tile must be a multiple of 8 (sublane)"
    assert tb <= 4096, "batch_tile too large for the VMEM budget"

    B_pad = _round_up(B, tb)
    x_bf16 = x.astype(jnp.bfloat16)
    if B_pad != B:
        x_bf16 = jnp.pad(x_bf16, ((0, B_pad - B), (0, 0)))

    weight_order = [
        "w1", "b1", "g1", "be1",
        "w2", "b2", "g2", "be2",
        "w3", "b3", "g3", "be3",
        "w4", "b4",
    ]
    w_args = [params[k] for k in weight_order]

    # Per-tile VMEM footprint: double-buffered x/out blocks + (conservatively double-
    # buffered) weights + live f32 intermediates. Clamp the scoped limit to [8, 32] MiB.
    weight_bytes = sum(int(w.size) * w.dtype.itemsize for w in w_args)
    io_bytes = 2 * (tb * S * 2) + 2 * (tb * OUT_PAD * 4)
    act_bytes = tb * (256 + 128 + 64) * 4
    vmem_est = 2 * weight_bytes + io_bytes + act_bytes
    vmem_limit = int(min(max(2 * vmem_est, 8 * 1024 * 1024), 32 * 1024 * 1024))

    x_spec = pl.BlockSpec((tb, S), lambda i: (i, 0))
    o_spec = pl.BlockSpec((tb, OUT_PAD), lambda i: (i, 0))
    # Constant index_map => each weight is DMA'd once and stays VMEM-resident.
    w_specs = [pl.BlockSpec(w.shape, lambda i: (0, 0)) for w in w_args]

    out_pad = pl.pallas_call(
        dqn_kernel,
        out_shape=jax.ShapeDtypeStruct((B_pad, OUT_PAD), jnp.float32),
        grid_spec=pltpu.PrefetchScalarGridSpec(
            num_scalar_prefetch=0,
            grid=(B_pad // tb,),
            in_specs=[x_spec] + w_specs,
            out_specs=o_spec,
        ),
        compiler_params=pltpu.CompilerParams(
            dimension_semantics=("parallel",),
            vmem_limit_bytes=vmem_limit,
        ),
    )(x_bf16, *w_args)

    return out_pad[:B, :action_size]


def init_dqn_params(key, state_size, action_size):
    """Deterministic init mimicking PyTorch defaults (uniform +-1/sqrt(fan_in) for Linear,
    ones/zeros for LayerNorm). Weights stored as [in, out] in bf16; biases / LN params f32.
    The final layer is zero-padded to OUT_PAD lanes for lane-dense stores."""
    dims = [(state_size, 256), (256, 128), (128, 64), (64, action_size)]
    params = {}
    keys = jax.random.split(key, 2 * len(dims))
    for i, (fan_in, fan_out) in enumerate(dims):
        bound = 1.0 / (fan_in ** 0.5)
        w = jax.random.uniform(keys[2 * i], (fan_in, fan_out), jnp.float32, -bound, bound)
        b = jax.random.uniform(keys[2 * i + 1], (1, fan_out), jnp.float32, -bound, bound)
        if i == 3:  # pad final layer to lane-dense width
            w = jnp.pad(w, ((0, 0), (0, OUT_PAD - fan_out)))
            b = jnp.pad(b, ((0, 0), (0, OUT_PAD - fan_out)))
        params[f"w{i+1}"] = w.astype(jnp.bfloat16)  # matmul operands in bf16
        params[f"b{i+1}"] = b                       # biases stay f32
        if i < 3:  # LayerNorm after fc1, fc2, fc3
            params[f"g{i+1}"] = jnp.ones((1, fan_out), jnp.float32)
            params[f"be{i+1}"] = jnp.zeros((1, fan_out), jnp.float32)
    return params


def dqn_forward_ref(x, params, action_size):
    """Pure-JAX reference with identical numerics (bf16 matmul operands, f32 accumulation,
    f32 LayerNorm / LeakyReLU; dropout = identity in eval)."""
    h = x.astype(jnp.bfloat16)
    for i in range(1, 4):
        h = jnp.dot(h, params[f"w{i}"], preferred_element_type=jnp.float32) + params[f"b{i}"]
        mu = jnp.mean(h, axis=-1, keepdims=True)
        var = jnp.mean((h - mu) ** 2, axis=-1, keepdims=True)
        h = (h - mu) * jax.lax.rsqrt(var + LN_EPS) * params[f"g{i}"] + params[f"be{i}"]
        h = jnp.where(h > 0, h, LEAKY_SLOPE * h)
        h = h.astype(jnp.bfloat16)
    out = jnp.dot(h, params["w4"], preferred_element_type=jnp.float32) + params["b4"]
    return out[:, :action_size]


if __name__ == "__main__":
    state_size = 16
    action_size = 4
    batch = 64  # small test batch; default tile tb=32 -> a 2-step grid

    key = jax.random.PRNGKey(0)
    k_params, k_x = jax.random.split(key)
    params = init_dqn_params(k_params, state_size, action_size)
    x = jax.random.normal(k_x, (batch, state_size), jnp.float32)

    out = dqn_forward(x, params, action_size)
    out = jax.block_until_ready(out)

    ref = dqn_forward_ref(x, params, action_size)
    assert out.shape == (batch, action_size)
    assert jnp.allclose(out, ref, atol=1e-2, rtol=1e-2), "mismatch vs reference"

    print("KERNEL_OK")
</pallas_src>

<mosaic_0001>
module attributes {stable_mosaic.version = 11 : i64} {
  func.func @dqn_kernel(%arg0: i32, %arg1: memref<32x16xbf16, #tpu.memory_space<vmem>>, %arg2: memref<16x256xbf16, #tpu.memory_space<vmem>>, %arg3: memref<1x256xf32, #tpu.memory_space<vmem>>, %arg4: memref<1x256xf32, #tpu.memory_space<vmem>>, %arg5: memref<1x256xf32, #tpu.memory_space<vmem>>, %arg6: memref<256x128xbf16, #tpu.memory_space<vmem>>, %arg7: memref<1x128xf32, #tpu.memory_space<vmem>>, %arg8: memref<1x128xf32, #tpu.memory_space<vmem>>, %arg9: memref<1x128xf32, #tpu.memory_space<vmem>>, %arg10: memref<128x64xbf16, #tpu.memory_space<vmem>>, %arg11: memref<1x64xf32, #tpu.memory_space<vmem>>, %arg12: memref<1x64xf32, #tpu.memory_space<vmem>>, %arg13: memref<1x64xf32, #tpu.memory_space<vmem>>, %arg14: memref<64x128xbf16, #tpu.memory_space<vmem>>, %arg15: memref<1x128xf32, #tpu.memory_space<vmem>>, %arg16: memref<32x128xf32, #tpu.memory_space<vmem>>) attributes {dimension_semantics = [#tpu.dimension_semantics<parallel>], iteration_bounds = array<i64: 2>, scalar_prefetch = 0 : i64, scratch_operands = 0 : i64, tpu.core_type = #tpu.core_type<tc>, window_params = [{transform_indices = @transform_0, window_bounds = array<i64: 32, 16>}, {pipeline_mode = #tpu.pipeline_mode<synchronous>, transform_indices = @transform_1, window_bounds = array<i64: 16, 256>}, {pipeline_mode = #tpu.pipeline_mode<synchronous>, transform_indices = @transform_2, window_bounds = array<i64: 1, 256>}, {pipeline_mode = #tpu.pipeline_mode<synchronous>, transform_indices = @transform_3, window_bounds = array<i64: 1, 256>}, {pipeline_mode = #tpu.pipeline_mode<synchronous>, transform_indices = @transform_4, window_bounds = array<i64: 1, 256>}, {pipeline_mode = #tpu.pipeline_mode<synchronous>, transform_indices = @transform_5, window_bounds = array<i64: 256, 128>}, {pipeline_mode = #tpu.pipeline_mode<synchronous>, transform_indices = @transform_6, window_bounds = array<i64: 1, 128>}, {pipeline_mode = #tpu.pipeline_mode<synchronous>, transform_indices = @transform_7, window_bounds = array<i64: 1, 128>}, {pipeline_mode = #tpu.pipeline_mode<synchronous>, transform_indices = @transform_8, window_bounds = array<i64: 1, 128>}, {pipeline_mode = #tpu.pipeline_mode<synchronous>, transform_indices = @transform_9, window_bounds = array<i64: 128, 64>}, {pipeline_mode = #tpu.pipeline_mode<synchronous>, transform_indices = @transform_10, window_bounds = array<i64: 1, 64>}, {pipeline_mode = #tpu.pipeline_mode<synchronous>, transform_indices = @transform_11, window_bounds = array<i64: 1, 64>}, {pipeline_mode = #tpu.pipeline_mode<synchronous>, transform_indices = @transform_12, window_bounds = array<i64: 1, 64>}, {pipeline_mode = #tpu.pipeline_mode<synchronous>, transform_indices = @transform_13, window_bounds = array<i64: 64, 128>}, {pipeline_mode = #tpu.pipeline_mode<synchronous>, transform_indices = @transform_14, window_bounds = array<i64: 1, 128>}, {transform_indices = @transform_15, window_bounds = array<i64: 32, 128>}]} {
    %c0 = arith.constant 0 : index
    %c0_0 = arith.constant 0 : index
    %0 = vector.load %arg1[%c0, %c0_0] : memref<32x16xbf16, #tpu.memory_space<vmem>>, vector<32x16xbf16>
    %c0_1 = arith.constant 0 : index
    %c0_2 = arith.constant 0 : index
    %1 = vector.load %arg2[%c0_1, %c0_2] : memref<16x256xbf16, #tpu.memory_space<vmem>>, vector<16x256xbf16>
    %cst = arith.constant dense<0.000000e+00> : vector<32x256xf32>
    %2 = tpu.matmul %0, %1, %cst {dimension_numbers = #tpu.dot_dimension_numbers<[1], [0], [0], [1], [0, 0, 1, 1], [], []>} : vector<32x16xbf16>, vector<16x256xbf16>, vector<32x256xf32> -> vector<32x256xf32>
    %c0_3 = arith.constant 0 : index
    %c0_4 = arith.constant 0 : index
    %3 = vector.load %arg3[%c0_3, %c0_4] : memref<1x256xf32, #tpu.memory_space<vmem>>, vector<1x256xf32>
    %4 = vector.broadcast %3 : vector<1x256xf32> to vector<32x256xf32>
    %5 = arith.addf %2, %4 : vector<32x256xf32>
    %cst_5 = arith.constant dense<0.000000e+00> : vector<32xf32>
    %6 = vector.multi_reduction <add>, %5, %cst_5 [1] : vector<32x256xf32> to vector<32xf32>
    %7 = vector.shape_cast %6 : vector<32xf32> to vector<32x1xf32>
    %cst_6 = arith.constant 2.560000e+02 : f32
    %8 = vector.broadcast %cst_6 : f32 to vector<32x1xf32>
    %9 = arith.divf %7, %8 : vector<32x1xf32>
    %10 = vector.broadcast %9 : vector<32x1xf32> to vector<32x256xf32>
    %11 = arith.subf %5, %10 : vector<32x256xf32>
    %12 = arith.mulf %11, %11 : vector<32x256xf32>
    %cst_7 = arith.constant dense<0.000000e+00> : vector<32xf32>
    %13 = vector.multi_reduction <add>, %12, %cst_7 [1] : vector<32x256xf32> to vector<32xf32>
    %14 = vector.shape_cast %13 : vector<32xf32> to vector<32x1xf32>
    %cst_8 = arith.constant 2.560000e+02 : f32
    %15 = vector.broadcast %cst_8 : f32 to vector<32x1xf32>
    %16 = arith.divf %14, %15 : vector<32x1xf32>
    %cst_9 = arith.constant 9.99999974E-6 : f32
    %17 = vector.broadcast %cst_9 : f32 to vector<32x1xf32>
    %18 = arith.addf %16, %17 : vector<32x1xf32>
    %19 = math.rsqrt %18 : vector<32x1xf32>
    %20 = vector.broadcast %19 : vector<32x1xf32> to vector<32x256xf32>
    %21 = arith.mulf %11, %20 : vector<32x256xf32>
    %c0_10 = arith.constant 0 : index
    %c0_11 = arith.constant 0 : index
    %22 = vector.load %arg4[%c0_10, %c0_11] : memref<1x256xf32, #tpu.memory_space<vmem>>, vector<1x256xf32>
    %23 = vector.broadcast %22 : vector<1x256xf32> to vector<32x256xf32>
    %24 = arith.mulf %21, %23 : vector<32x256xf32>
    %c0_12 = arith.constant 0 : index
    %c0_13 = arith.constant 0 : index
    %25 = vector.load %arg5[%c0_12, %c0_13] : memref<1x256xf32, #tpu.memory_space<vmem>>, vector<1x256xf32>
    %26 = vector.broadcast %25 : vector<1x256xf32> to vector<32x256xf32>
    %27 = arith.addf %24, %26 : vector<32x256xf32>
    %cst_14 = arith.constant 0.00999999977 : f32
    %28 = vector.broadcast %cst_14 : f32 to vector<32x256xf32>
    %29 = arith.mulf %28, %27 : vector<32x256xf32>
    %30 = arith.maximumf %27, %29 : vector<32x256xf32>
    %31 = arith.truncf %30 : vector<32x256xf32> to vector<32x256xbf16>
    %c0_15 = arith.constant 0 : index
    %c0_16 = arith.constant 0 : index
    %32 = vector.load %arg6[%c0_15, %c0_16] : memref<256x128xbf16, #tpu.memory_space<vmem>>, vector<256x128xbf16>
    %cst_17 = arith.constant dense<0.000000e+00> : vector<32x128xf32>
    %33 = tpu.matmul %31, %32, %cst_17 {dimension_numbers = #tpu.dot_dimension_numbers<[1], [0], [0], [1], [0, 0, 1, 1], [], []>} : vector<32x256xbf16>, vector<256x128xbf16>, vector<32x128xf32> -> vector<32x128xf32>
    %c0_18 = arith.constant 0 : index
    %c0_19 = arith.constant 0 : index
    %34 = vector.load %arg7[%c0_18, %c0_19] : memref<1x128xf32, #tpu.memory_space<vmem>>, vector<1x128xf32>
    %35 = vector.broadcast %34 : vector<1x128xf32> to vector<32x128xf32>
    %36 = arith.addf %33, %35 : vector<32x128xf32>
    %cst_20 = arith.constant dense<0.000000e+00> : vector<32xf32>
    %37 = vector.multi_reduction <add>, %36, %cst_20 [1] : vector<32x128xf32> to vector<32xf32>
    %38 = vector.shape_cast %37 : vector<32xf32> to vector<32x1xf32>
    %cst_21 = arith.constant 1.280000e+02 : f32
    %39 = vector.broadcast %cst_21 : f32 to vector<32x1xf32>
    %40 = arith.divf %38, %39 : vector<32x1xf32>
    %41 = vector.broadcast %40 : vector<32x1xf32> to vector<32x128xf32>
    %42 = arith.subf %36, %41 : vector<32x128xf32>
    %43 = arith.mulf %42, %42 : vector<32x128xf32>
    %cst_22 = arith.constant dense<0.000000e+00> : vector<32xf32>
    %44 = vector.multi_reduction <add>, %43, %cst_22 [1] : vector<32x128xf32> to vector<32xf32>
    %45 = vector.shape_cast %44 : vector<32xf32> to vector<32x1xf32>
    %cst_23 = arith.constant 1.280000e+02 : f32
    %46 = vector.broadcast %cst_23 : f32 to vector<32x1xf32>
    %47 = arith.divf %45, %46 : vector<32x1xf32>
    %cst_24 = arith.constant 9.99999974E-6 : f32
    %48 = vector.broadcast %cst_24 : f32 to vector<32x1xf32>
    %49 = arith.addf %47, %48 : vector<32x1xf32>
    %50 = math.rsqrt %49 : vector<32x1xf32>
    %51 = vector.broadcast %50 : vector<32x1xf32> to vector<32x128xf32>
    %52 = arith.mulf %42, %51 : vector<32x128xf32>
    %c0_25 = arith.constant 0 : index
    %c0_26 = arith.constant 0 : index
    %53 = vector.load %arg8[%c0_25, %c0_26] : memref<1x128xf32, #tpu.memory_space<vmem>>, vector<1x128xf32>
    %54 = vector.broadcast %53 : vector<1x128xf32> to vector<32x128xf32>
    %55 = arith.mulf %52, %54 : vector<32x128xf32>
    %c0_27 = arith.constant 0 : index
    %c0_28 = arith.constant 0 : index
    %56 = vector.load %arg9[%c0_27, %c0_28] : memref<1x128xf32, #tpu.memory_space<vmem>>, vector<1x128xf32>
    %57 = vector.broadcast %56 : vector<1x128xf32> to vector<32x128xf32>
    %58 = arith.addf %55, %57 : vector<32x128xf32>
    %cst_29 = arith.constant 0.00999999977 : f32
    %59 = vector.broadcast %cst_29 : f32 to vector<32x128xf32>
    %60 = arith.mulf %59, %58 : vector<32x128xf32>
    %61 = arith.maximumf %58, %60 : vector<32x128xf32>
    %62 = arith.truncf %61 : vector<32x128xf32> to vector<32x128xbf16>
    %c0_30 = arith.constant 0 : index
    %c0_31 = arith.constant 0 : index
    %63 = vector.load %arg10[%c0_30, %c0_31] : memref<128x64xbf16, #tpu.memory_space<vmem>>, vector<128x64xbf16>
    %cst_32 = arith.constant dense<0.000000e+00> : vector<32x64xf32>
    %64 = tpu.matmul %62, %63, %cst_32 {dimension_numbers = #tpu.dot_dimension_numbers<[1], [0], [0], [1], [0, 0, 1, 1], [], []>} : vector<32x128xbf16>, vector<128x64xbf16>, vector<32x64xf32> -> vector<32x64xf32>
    %c0_33 = arith.constant 0 : index
    %c0_34 = arith.constant 0 : index
    %65 = vector.load %arg11[%c0_33, %c0_34] : memref<1x64xf32, #tpu.memory_space<vmem>>, vector<1x64xf32>
    %66 = vector.broadcast %65 : vector<1x64xf32> to vector<32x64xf32>
    %67 = arith.addf %64, %66 : vector<32x64xf32>
    %cst_35 = arith.constant dense<0.000000e+00> : vector<32xf32>
    %68 = vector.multi_reduction <add>, %67, %cst_35 [1] : vector<32x64xf32> to vector<32xf32>
    %69 = vector.shape_cast %68 : vector<32xf32> to vector<32x1xf32>
    %cst_36 = arith.constant 6.400000e+01 : f32
    %70 = vector.broadcast %cst_36 : f32 to vector<32x1xf32>
    %71 = arith.divf %69, %70 : vector<32x1xf32>
    %72 = vector.broadcast %71 : vector<32x1xf32> to vector<32x64xf32>
    %73 = arith.subf %67, %72 : vector<32x64xf32>
    %74 = arith.mulf %73, %73 : vector<32x64xf32>
    %cst_37 = arith.constant dense<0.000000e+00> : vector<32xf32>
    %75 = vector.multi_reduction <add>, %74, %cst_37 [1] : vector<32x64xf32> to vector<32xf32>
    %76 = vector.shape_cast %75 : vector<32xf32> to vector<32x1xf32>
    %cst_38 = arith.constant 6.400000e+01 : f32
    %77 = vector.broadcast %cst_38 : f32 to vector<32x1xf32>
    %78 = arith.divf %76, %77 : vector<32x1xf32>
    %cst_39 = arith.constant 9.99999974E-6 : f32
    %79 = vector.broadcast %cst_39 : f32 to vector<32x1xf32>
    %80 = arith.addf %78, %79 : vector<32x1xf32>
    %81 = math.rsqrt %80 : vector<32x1xf32>
    %82 = vector.broadcast %81 : vector<32x1xf32> to vector<32x64xf32>
    %83 = arith.mulf %73, %82 : vector<32x64xf32>
    %c0_40 = arith.constant 0 : index
    %c0_41 = arith.constant 0 : index
    %84 = vector.load %arg12[%c0_40, %c0_41] : memref<1x64xf32, #tpu.memory_space<vmem>>, vector<1x64xf32>
    %85 = vector.broadcast %84 : vector<1x64xf32> to vector<32x64xf32>
    %86 = arith.mulf %83, %85 : vector<32x64xf32>
    %c0_42 = arith.constant 0 : index
    %c0_43 = arith.constant 0 : index
    %87 = vector.load %arg13[%c0_42, %c0_43] : memref<1x64xf32, #tpu.memory_space<vmem>>, vector<1x64xf32>
    %88 = vector.broadcast %87 : vector<1x64xf32> to vector<32x64xf32>
    %89 = arith.addf %86, %88 : vector<32x64xf32>
    %cst_44 = arith.constant 0.00999999977 : f32
    %90 = vector.broadcast %cst_44 : f32 to vector<32x64xf32>
    %91 = arith.mulf %90, %89 : vector<32x64xf32>
    %92 = arith.maximumf %89, %91 : vector<32x64xf32>
    %93 = arith.truncf %92 : vector<32x64xf32> to vector<32x64xbf16>
    %c0_45 = arith.constant 0 : index
    %c0_46 = arith.constant 0 : index
    %94 = vector.load %arg14[%c0_45, %c0_46] : memref<64x128xbf16, #tpu.memory_space<vmem>>, vector<64x128xbf16>
    %cst_47 = arith.constant dense<0.000000e+00> : vector<32x128xf32>
    %95 = tpu.matmul %93, %94, %cst_47 {dimension_numbers = #tpu.dot_dimension_numbers<[1], [0], [0], [1], [0, 0, 1, 1], [], []>} : vector<32x64xbf16>, vector<64x128xbf16>, vector<32x128xf32> -> vector<32x128xf32>
    %c0_48 = arith.constant 0 : index
    %c0_49 = arith.constant 0 : index
    %96 = vector.load %arg15[%c0_48, %c0_49] : memref<1x128xf32, #tpu.memory_space<vmem>>, vector<1x128xf32>
    %97 = vector.broadcast %96 : vector<1x128xf32> to vector<32x128xf32>
    %98 = arith.addf %95, %97 : vector<32x128xf32>
    %c0_50 = arith.constant 0 : index
    %c0_51 = arith.constant 0 : index
    %99 = vector.load %arg16[%c0_50, %c0_51] : memref<32x128xf32, #tpu.memory_space<vmem>>, vector<32x128xf32>
    tpu.vector_store %arg16[%c0_50, %c0_51], %98 {strides = array<i32>} : memref<32x128xf32, #tpu.memory_space<vmem>>, vector<32x128xf32>,
    return
  }
  func.func @transform_0(%arg0: i32) -> (i32, i32) {
    %c0_i32 = arith.constant 0 : i32
    %c0_i32_0 = arith.constant 0 : i32
    return %arg0, %c0_i32 : i32, i32
  }
  func.func @transform_1(%arg0: i32) -> (i32, i32) {
    %c0_i32 = arith.constant 0 : i32
    %c0_i32_0 = arith.constant 0 : i32
    %c0_i32_1 = arith.constant 0 : i32
    return %c0_i32, %c0_i32_0 : i32, i32
  }
  func.func @transform_2(%arg0: i32) -> (i32, i32) {
    %c0_i32 = arith.constant 0 : i32
    %c0_i32_0 = arith.constant 0 : i32
    %c0_i32_1 = arith.constant 0 : i32
    return %c0_i32, %c0_i32_0 : i32, i32
  }
  func.func @transform_3(%arg0: i32) -> (i32, i32) {
    %c0_i32 = arith.constant 0 : i32
    %c0_i32_0 = arith.constant 0 : i32
    %c0_i32_1 = arith.constant 0 : i32
    return %c0_i32, %c0_i32_0 : i32, i32
  }
  func.func @transform_4(%arg0: i32) -> (i32, i32) {
    %c0_i32 = arith.constant 0 : i32
    %c0_i32_0 = arith.constant 0 : i32
    %c0_i32_1 = arith.constant 0 : i32
    return %c0_i32, %c0_i32_0 : i32, i32
  }
  func.func @transform_5(%arg0: i32) -> (i32, i32) {
    %c0_i32 = arith.constant 0 : i32
    %c0_i32_0 = arith.constant 0 : i32
    %c0_i32_1 = arith.constant 0 : i32
    return %c0_i32, %c0_i32_0 : i32, i32
  }
  func.func @transform_6(%arg0: i32) -> (i32, i32) {
    %c0_i32 = arith.constant 0 : i32
    %c0_i32_0 = arith.constant 0 : i32
    %c0_i32_1 = arith.constant 0 : i32
    return %c0_i32, %c0_i32_0 : i32, i32
  }
  func.func @transform_7(%arg0: i32) -> (i32, i32) {
    %c0_i32 = arith.constant 0 : i32
    %c0_i32_0 = arith.constant 0 : i32
    %c0_i32_1 = arith.constant 0 : i32
    return %c0_i32, %c0_i32_0 : i32, i32
  }
  func.func @transform_8(%arg0: i32) -> (i32, i32) {
    %c0_i32 = arith.constant 0 : i32
    %c0_i32_0 = arith.constant 0 : i32
    %c0_i32_1 = arith.constant 0 : i32
    return %c0_i32, %c0_i32_0 : i32, i32
  }
  func.func @transform_9(%arg0: i32) -> (i32, i32) {
    %c0_i32 = arith.constant 0 : i32
    %c0_i32_0 = arith.constant 0 : i32
    %c0_i32_1 = arith.constant 0 : i32
    return %c0_i32, %c0_i32_0 : i32, i32
  }
  func.func @transform_10(%arg0: i32) -> (i32, i32) {
    %c0_i32 = arith.constant 0 : i32
    %c0_i32_0 = arith.constant 0 : i32
    %c0_i32_1 = arith.constant 0 : i32
    return %c0_i32, %c0_i32_0 : i32, i32
  }
  func.func @transform_11(%arg0: i32) -> (i32, i32) {
    %c0_i32 = arith.constant 0 : i32
    %c0_i32_0 = arith.constant 0 : i32
    %c0_i32_1 = arith.constant 0 : i32
    return %c0_i32, %c0_i32_0 : i32, i32
  }
  func.func @transform_12(%arg0: i32) -> (i32, i32) {
    %c0_i32 = arith.constant 0 : i32
    %c0_i32_0 = arith.constant 0 : i32
    %c0_i32_1 = arith.constant 0 : i32
    return %c0_i32, %c0_i32_0 : i32, i32
  }
  func.func @transform_13(%arg0: i32) -> (i32, i32) {
    %c0_i32 = arith.constant 0 : i32
    %c0_i32_0 = arith.constant 0 : i32
    %c0_i32_1 = arith.constant 0 : i32
    return %c0_i32, %c0_i32_0 : i32, i32
  }
  func.func @transform_14(%arg0: i32) -> (i32, i32) {
    %c0_i32 = arith.constant 0 : i32
    %c0_i32_0 = arith.constant 0 : i32
    %c0_i32_1 = arith.constant 0 : i32
    return %c0_i32, %c0_i32_0 : i32, i32
  }
  func.func @transform_15(%arg0: i32) -> (i32, i32) {
    %c0_i32 = arith.constant 0 : i32
    %c0_i32_0 = arith.constant 0 : i32
    return %arg0, %c0_i32 : i32, i32
  }
}

</mosaic_0001>

<bundles_post_ra>
// kernel: dqn_forward.1
= control target key start
LH: loop header
LB: loop body
LE: loop exit
PB: predicated region body
PF: predicated region fallthrough
CT: control target
= control target key end

     0   :  { %20 = vsyncpa [#allocation3], 0  ;;  %s2371_s0 = inlined_call_operand.vmem [shape: bf16[64,16], index: 0, kind: input, shape index: {}]   ;;  %s2372_s1 = inlined_call_operand.vmem [shape: bf16[16,256], index: 1, kind: input, shape index: {}]   ;;  %s2373_s2 = inlined_call_operand.vmem [shape: f32[1,256], index: 2, kind: input, shape index: {}]   ;;  %s2374_s3 = inlined_call_operand.vmem [shape: f32[1,256], index: 3, kind: input, shape index: {}]   ;;  %s2375_s4 = inlined_call_operand.hbm [shape: f32[1,256], index: 4, kind: input, shape index: {}]   ;;  %s2376_s5 = inlined_call_operand.vmem [shape: bf16[256,128], index: 5, kind: input, shape index: {}]   ;;  %s2377_s6 = inlined_call_operand.vmem [shape: f32[1,128], index: 6, kind: input, shape index: {}]   ;;  %s2378_s7 = inlined_call_operand.hbm [shape: f32[1,128], index: 7, kind: input, shape index: {}]   ;;  %s2379_s8 = inlined_call_operand.hbm [shape: f32[1,128], index: 8, kind: input, shape index: {}]   ;;  %s2380_s9 = inlined_call_operand.vmem [shape: bf16[128,64], index: 9, kind: input, shape index: {}]   ;;  %s2381_s10 = inlined_call_operand.hbm [shape: f32[1,64], index: 10, kind: input, shape index: {}]   ;;  %s2382_s11 = inlined_call_operand.hbm [shape: f32[1,64], index: 11, kind: input, shape index: {}]   ;;  %s2383_s12 = inlined_call_operand.hbm [shape: f32[1,64], index: 12, kind: input, shape index: {}]   ;;  %s2384_s13 = inlined_call_operand.vmem [shape: bf16[64,128], index: 13, kind: input, shape index: {}]   ;;  %s2385_s14 = inlined_call_operand.hbm [shape: f32[1,128], index: 14, kind: input, shape index: {}]   ;;  %s2386_s15 = inlined_call_operand.vmem [shape: f32[64,128], index: 15, kind: output, shape index: {}]  }
   0x1   :  { %21 = vsyncpa [#allocation5], 0 }
   0x2   :  { %22 = vsyncpa [#allocation8], 0 }
   0x3   :  { %23 = vsyncpa [#allocation11], 0  ;;  %s2075_s18 = smov 0  }
   0x4 LB: > { %s1987_s19 = smov [#allocation4]   ;;  %s1500_s21 = sadd.s32 4294967295, %s1985_s18   ;;  %s1985_s18 = sphi %s2075_s18, %s29_s18  }
   0x5   : > { %s419_s20 = sshll.u32 %s1987_s19, 4  ;;  %p1502_p0 = scmp.ge.s32.totalorder %s1985_s18, 1  ;;  %s420_s20 = int_to_ptr.vmem [resolvable:$true] %s419_s20 }
   0x6   : > { %p380_p1 = scmp.lt.s32.totalorder %s1985_s18, 3  ;;  %p2085_p2 = scmp.eq.s32.totalorder %s1500_s21, 0 }
   0x7   : > { %s1988_s24 = smov [#allocation7]   ;;  %s1989_s26 = smov [#allocation10]  }
   0x8   : > { %s2389_s22 = scalar_select %p2085_p2, 1, 0 }
   0x9   : > { %p2089_p3 = pnand %p1502_p0, %p380_p1  ;;  %s444_s25 = sshll.u32 %s1988_s24, 4  ;;  %s2095_s25 = int_to_ptr.vmem [resolvable:$true] %s444_s25 }
   0xa   : > { %s466_s27 = sshll.u32 %s1989_s26, 4  ;;  %s1990_s29 = smov [#allocation2]   ;;  %s2103_s27 = int_to_ptr.vmem [resolvable:$true] %s466_s27 }
   0xb   : > { %p1672_p4 = pneg %p2089_p3  ;;  %s402_s30 = sshll.u32 %s1990_s29, 4  ;;  %s2105_s30 = int_to_ptr.vmem [resolvable:$true] %s402_s30 }
   0xc   : > { %s1792_s17 = scalar_lea.vmem %s420_s20, 16  ;;  %s1799_s19 = scalar_lea.vmem %s420_s20, 32 }
   0xd   : > { %p2099_p5 = pnand %p2085_p2, %p1672_p4  ;;  %p1793_p7 = scmp.ne.s32.totalorder %s420_s20, %s1792_s17 }
   0xe   : > { %p1800_p10 = scmp.lt.s32.totalorder %s420_s20, %s420_s20  ;;  %p1801_p11 = scmp.lt.s32.totalorder %s1799_s19, %s1792_s17 }
   0xf   : > { %p2109_p6 = pneg %p2099_p5 }
  0x10   : > { %p1802_p12 = por %p1801_p11, %p1800_p10 }
  0x11   : > { %p1795_p8 = pnand %p1793_p7, %p2109_p6 }
  0x13   : > { %p1796_p9 = pneg %p1795_p8 }
  0x15   : > { %p1803_p13 = pnand %p1802_p12, %p1796_p9 }
  0x17   : > { %1806 = shalt.err (!%p1803_p13)
}
  0x18   : > { %1678 = dma.hbm_to_vmem [thread:$0]  (!%p2099_p5), %s2378_s7, 16, %s420_s20, [#allocation5]  }
  0x19   : > { %s1818_s29 = scalar_lea.vmem %s2095_s25, 16  ;;  %s1825_s17 = scalar_lea.vmem %s2095_s25, 32 }
  0x1a   : > { %p1819_p0 = scmp.ne.s32.totalorder %s2095_s25, %s1818_s29  ;;  %p1826_p7 = scmp.lt.s32.totalorder %s2095_s25, %s2095_s25 }
  0x1b   : > { %p1827_p8 = scmp.lt.s32.totalorder %s1825_s17, %s1818_s29 }
  0x1c   : > { %p1821_p1 = pnand %p1819_p0, %p2109_p6 }
  0x1d   : > { %p1828_p9 = por %p1827_p8, %p1826_p7 }
  0x1e   : > { %p1822_p4 = pneg %p1821_p1 }
  0x20   : > { %p1829_p10 = pnand %p1828_p9, %p1822_p4 }
  0x22   : > { %1832 = shalt.err (!%p1829_p10)
}
  0x23   : > { %1684 = dma.hbm_to_vmem [thread:$0]  (!%p2099_p5), %s2381_s10, 16, %s2095_s25, [#allocation8]  }
  0x24   : > { %s1844_s20 = scalar_lea.vmem %s2103_s27, 16  ;;  %s1851_s26 = scalar_lea.vmem %s2103_s27, 32 }
  0x25   : > { %p1845_p11 = scmp.ne.s32.totalorder %s2103_s27, %s1844_s20  ;;  %p1852_p0 = scmp.lt.s32.totalorder %s2103_s27, %s2103_s27 }
  0x26   : > { %p1853_p1 = scmp.lt.s32.totalorder %s1851_s26, %s1844_s20 }
  0x27   : > { %p1847_p12 = pnand %p1845_p11, %p2109_p6 }
  0x28   : > { %p1854_p4 = por %p1853_p1, %p1852_p0 }
  0x29   : > { %p1848_p13 = pneg %p1847_p12 }
  0x2b   : > { %p1855_p7 = pnand %p1854_p4, %p1848_p13 }
  0x2d   : > { %1858 = shalt.err (!%p1855_p7)
}
  0x2e   : > { %1690 = dma.hbm_to_vmem [thread:$0]  (!%p2099_p5), %s2383_s12, 16, %s2103_s27, [#allocation11]  }
  0x2f   : > { %s1870_s25 = scalar_lea.vmem %s2105_s30, 32  ;;  %p1878_p11 = scmp.lt.s32.totalorder %s2105_s30, %s2105_s30 }
  0x30   : > { %p1871_p8 = scmp.ne.s32.totalorder %s2105_s30, %s1870_s25  ;;  %p1879_p12 = scmp.lt.s32.totalorder %s1870_s25, %s1870_s25 }
  0x32   : > { %p1873_p9 = pnand %p1871_p8, %p2109_p6  ;;  %p1880_p13 = por %p1879_p12, %p1878_p11 }
  0x34   : > { %p1874_p10 = pneg %p1873_p9 }
  0x36   : > { %p1881_p0 = pnand %p1880_p13, %p1874_p10 }
  0x38   : > { %1884 = shalt.err (!%p1881_p0)
}
  0x39   : > { %1675 = dma.hbm_to_vmem [thread:$0]  (!%p2099_p5), %s2375_s4, 32, %s2105_s30, [#allocation3]  }
  0x3a   : > { %s1991_s27 = smov [#allocation6]   ;;  %s1992_s26 = smov [#allocation9]  }
  0x3b   : > { %s430_s20 = sshll.u32 %s1991_s27, 4  ;;  %s455_s29 = sshll.u32 %s1992_s26, 4  ;;  %s431_s20 = int_to_ptr.vmem [resolvable:$true] %s430_s20  ;;  %s456_s29 = int_to_ptr.vmem [resolvable:$true] %s455_s29 }
  0x3c   : > { %s1896_s17 = scalar_lea.vmem %s431_s20, 16  ;;  %s1903_s25 = scalar_lea.vmem %s431_s20, 32 }
  0x3d   : > { %p1897_p1 = scmp.ne.s32.totalorder %s431_s20, %s1896_s17  ;;  %p1904_p8 = scmp.lt.s32.totalorder %s431_s20, %s431_s20 }
  0x3e   : > { %p1905_p9 = scmp.lt.s32.totalorder %s1903_s25, %s1896_s17 }
  0x3f   : > { %p1899_p4 = pnand %p1897_p1, %p2109_p6 }
  0x40   : > { %p1906_p10 = por %p1905_p9, %p1904_p8 }
  0x41   : > { %p1900_p7 = pneg %p1899_p4 }
  0x43   : > { %p1907_p11 = pnand %p1906_p10, %p1900_p7 }
  0x45   : > { %1910 = shalt.err (!%p1907_p11)
}
  0x46   : > { %1681 = dma.hbm_to_vmem [thread:$0]  (!%p2099_p5), %s2379_s8, 16, %s431_s20, [#allocation5]  }
  0x47   : > { %s1922_s24 = scalar_lea.vmem %s456_s29, 16  ;;  %s1929_s27 = scalar_lea.vmem %s456_s29, 32 }
  0x48   : > { %p1923_p12 = scmp.ne.s32.totalorder %s456_s29, %s1922_s24  ;;  %p1930_p1 = scmp.lt.s32.totalorder %s456_s29, %s456_s29 }
  0x49   : > { %p1931_p4 = scmp.lt.s32.totalorder %s1929_s27, %s1922_s24 }
  0x4a   : > { %p1925_p13 = pnand %p1923_p12, %p2109_p6 }
  0x4b   : > { %p1932_p2 = por %p1931_p4, %p1930_p1 }
  0x4c   : > { %p1926_p0 = pneg %p1925_p13 }
  0x4e   : > { %p1933_p8 = pnand %p1932_p2, %p1926_p0 }
  0x50   : > { %1936 = shalt.err (!%p1933_p8)
}
  0x51   : > { %1687 = dma.hbm_to_vmem [thread:$0]  (!%p2099_p5), %s2382_s11, 16, %s456_s29, [#allocation8]  }
  0x52   : > { %s1993_s20 = smov [#allocation12]  }
  0x53   : > { %s480_s25 = sshll.u32 %s1993_s20, 4  ;;  %s481_s25 = int_to_ptr.vmem [resolvable:$true] %s480_s25 }
  0x54   : > { %s1948_s19 = scalar_lea.vmem %s481_s25, 16  ;;  %s1955_s30 = scalar_lea.vmem %s481_s25, 32 }
  0x55   : > { %p1949_p7 = scmp.ne.s32.totalorder %s481_s25, %s1948_s19  ;;  %p1956_p11 = scmp.lt.s32.totalorder %s481_s25, %s481_s25 }
  0x56   : > { %p1957_p12 = scmp.lt.s32.totalorder %s1955_s30, %s1948_s19 }
  0x57   : > { %p1951_p9 = pnand %p1949_p7, %p2109_p6 }
  0x58   : > { %p1958_p2 = por %p1957_p12, %p1956_p11 }
  0x59   : > { %p1952_p10 = pneg %p1951_p9 }
  0x5b   : > { %p1959_p13 = pnand %p1958_p2, %p1952_p10 }
  0x5d   : > { %1962 = shalt.err (!%p1959_p13)
}
  0x5e   : > { %1693 = dma.hbm_to_vmem [thread:$0]  (!%p2099_p5), %s2385_s14, 16, %s481_s25, [#allocation11]  }
  0x5f   : > { %502 = sbr.rel (%p2089_p3) target bundleno = 1876 (0x754), region = 80  ;;  %p2393_p0 = scmp.ne.s32.totalorder (!%p2089_p3), %s2389_s22, 0 }
  0x64   : > { %1968 = dma.done.wait (%p2393_p0), [#allocation3], 32  }
  0x65   : > { %1970 = vsyncadd (%p2393_p0), [#allocation3], 4294967264 }
  0x66   : > { %1972 = dma.done.wait (%p2393_p0), [#allocation5], 32  }
  0x67   : > { %1974 = vsyncadd (%p2393_p0), [#allocation5], 4294967264 }
  0x68   : > { %1976 = dma.done.wait (%p2393_p0), [#allocation8], 32  }
  0x69   : > { %1978 = vsyncadd (%p2393_p0), [#allocation8], 4294967264 }
  0x6a   : > { %1980 = dma.done.wait (%p2393_p0), [#allocation11], 32  }
  0x6b   : > { %1982 = vsyncadd (%p2393_p0), [#allocation11], 4294967264  ;;  %s1519_s23 = sshll.u32 %s1500_s21, 2  ;;  %v1994_v0 = vmov 0   ;;  %v1724_v1 = vld [vmem:[%s2372_s1 + $0x4] ss:$8 sps:$4 sm:$0xff]   ;;  %v595_v5 = vlaneseq }
  0x6c   : > { %664 = vmatprep.mubr.bf16.mxu0 %v1994_v0  ;;  %p575_p3 = scmp.lt.s32.totalorder %s1519_s23, 7  ;;  %v1726_v2 = vld [vmem:[%s2372_s1] ss:$8 sps:$4 sm:$0xff]   ;;  %646 = vmatprep.subr.bf16.mxu0 %v1724_v1  ;;  %vm625_vm0 = vcmask 130048   ;;  %v1729_v60 = vld [vmem:[%s2376_s5 + $0x78] sm:$0xff]   ;;  %v1731_v62 = vld [vmem:[%s2376_s5 + $0x70] sm:$0xff]  }
  0x6d   : > { %647 = vmatpush1.bf16.msra.mxu0 %v1726_v2  ;;  %v596_v6 = vshrl.u32 %v595_v5, 7  ;;  %v593_v9 = vld [vmem:[%s2373_s2] sm:$0x3]  ;;  %v1730_v61 = vld [vmem:[%s2376_s5 + $0x38] sm:$0xff]   ;;  %1568 = vmatprep.subr.bf16.mxu1 %v1729_v60  ;;  %v1732_v63 = vld [vmem:[%s2376_s5 + $0x30] sm:$0xff]   ;;  %vm1191_vm1 = vcmask 523264  }
  0x6e   : > { %s2395_s23 = smov (!%p575_p3, %s1519_s23), 7  ;;  %1569 = vmatpush3.bf16.msra.mxu1 %v1730_v61  ;;  %v1734_v1 = vld [vmem:[%s2376_s5 + $0x28] sm:$0xff]   ;;  %v1735_v2 = vld [vmem:[%s2376_s5 + $0x60] sm:$0xff]   ;;  %v1738_v5 = vld [vmem:[%s2376_s5 + $0x18] sm:$0xff]  }
  0x6f   : > { %s1520_s28 = sshll.u32 %s2395_s23, 2  ;;  %v2211_v7 = vsub.s32 0, %v596_v6  ;;  %v2213_v8 = vsub.s32 1, %v596_v6  ;;  %1570 = vmatprep.subr.bf16.mxu1 %v1731_v62  ;;  %v1739_v6 = vld [vmem:[%s2376_s5 + $0x50] sm:$0xff]   ;;  %s1522_s20 = sshll.u32 %s2395_s23, 3 }
  0x70   : > { %s578_s26 = scalar_lea.vmem %s2371_s0, %s1520_s28  ;;  %s584_s21 = scalar_lea.vmem %s2386_s15, %s1522_s20 }
  0x71   : > { %v1727_v3 = vld [vmem:[%s578_s26] sm:$0xff]   ;;  %v1728_v4 = vld [vmem:[%s578_s26 + $0x8] sm:$0xff]   ;;  %v598_v10 = vrot.slane %v593_v9, %v2211_v7  ;;  %v602_v11 = vrot.slane %v593_v9, %v2213_v8  ;;  %v1740_v9 = vld [vmem:[%s2376_s5 + $0x10] sm:$0xff]  }
  0x72   : > { %1527 = vmatmul.mubr.msk.bf16.vlgmr.msra.gmra.mxu0 %vm625_vm0, %v1727_v3  ;;  %1571 = vmatpush3.bf16.msra.mxu1 %v1732_v63  ;;  %v1736_v3 = vld [vmem:[%s2376_s5 + $0x20] sm:$0xff]  }
  0x73   : > { %674 = vmatprep.mubr.bf16.mxu0 %v1994_v0  ;;  %v1733_v0 = vld [vmem:[%s2376_s5 + $0x68] sm:$0xff]  }
  0x74   : > { %1572 = vmatprep.subr.bf16.mxu1 %v1733_v0 }
  0x76   : > { %1573 = vmatpush3.bf16.msra.mxu1 %v1734_v1 }
  0x77   : > { %1574 = vmatprep.subr.bf16.mxu1 %v1735_v2 }
  0x7a   : > { %1528 = vmatmul.mubr.msk.bf16.gmra.mxu0 %vm625_vm0, %v1728_v4  ;;  %1575 = vmatpush3.bf16.msra.mxu1 %v1736_v3  ;;  %v1737_v4 = vld [vmem:[%s2376_s5 + $0x58] sm:$0xff]  }
  0x7b   : > { %1576 = vmatprep.subr.bf16.mxu1 %v1737_v4 }
  0x7e   : > { %1577 = vmatpush3.bf16.msra.mxu1 %v1738_v5 }
  0x7f   : > { %1578 = vmatprep.subr.bf16.mxu1 %v1739_v6 }
  0x82   : > { %1579 = vmatpush3.bf16.msra.mxu1 %v1740_v9 }
 0x132   : > { %v666_v12 = vpop.f32.mrf.mxu0 }
 0x133   : > { %v667_v14 = vadd.f32 %v666_v12, %v598_v10  ;;  %v1743_v12 = vld [vmem:[%s2376_s5 + $0x40] sm:$0xff]  }
 0x134   : > { %v668_v13 = vpop.f32.mrf.mxu0 }
 0x135   : > { %v669_v15 = vadd.f32 %v668_v13, %v602_v11  ;;  %v1744_v13 = vld [vmem:[%s2376_s5] sm:$0xff]  }
 0x136   : > { %v670_v16 = vpop.f32.mrf.mxu0 }
 0x137   : > { %v685_v17 = vadd.f32 %v669_v15, %v667_v14  ;;  %v671_v19 = vadd.f32 %v670_v16, %v598_v10 }
 0x138   : > { %v672_v18 = vpop.f32.mrf.mxu0 }
 0x139   : > { %v673_v20 = vadd.f32 %v672_v18, %v602_v11  ;;  %686 = vadd.xlane.f32.xlu0 %v685_v17 }
 0x13a   : > { %v676_v21 = vpop.f32.mrf.mxu0 }
 0x13b   : > { %v688_v22 = vadd.f32 %v673_v20, %v671_v19  ;;  %v677_v24 = vadd.f32 %v676_v21, %v598_v10 }
 0x13c   : > { %v678_v23 = vpop.f32.mrf.mxu0 }
 0x13d   : > { %v679_v25 = vadd.f32 %v678_v23, %v602_v11  ;;  %689 = vadd.xlane.f32.xlu0 %v688_v22 }
 0x13e   : > { %v680_v26 = vpop.f32.mrf.mxu0 }
 0x13f   : > { %v691_v27 = vadd.f32 %v679_v25, %v677_v24  ;;  %v681_v29 = vadd.f32 %v680_v26, %v598_v10  ;;  %v1741_v10 = vld [vmem:[%s2376_s5 + $0x48] sm:$0xff]  }
 0x140   : > { %v682_v28 = vpop.f32.mrf.mxu0  ;;  %1580 = vmatprep.subr.bf16.mxu1 %v1741_v10 }
 0x141   : > { %v683_v30 = vadd.f32 %v682_v28, %v602_v11  ;;  %692 = vadd.xlane.f32.xlu1 %v691_v27  ;;  %v1742_v11 = vld [vmem:[%s2376_s5 + $0x8] sm:$0xff]   ;;  %v770_v27 = vld [vmem:[#allocation2] sm:$0x3] }
 0x142   : > { %1581 = vmatpush3.bf16.msra.mxu1 %v1742_v11 }
 0x143   : > { %v694_v31 = vadd.f32 %v683_v30, %v681_v29  ;;  %1582 = vmatprep.subr.bf16.mxu1 %v1743_v12 }
 0x145   : > { %695 = vadd.xlane.f32.xlu1 %v694_v31 }
 0x146   : > { %1583 = vmatpush3.bf16.msra.mxu1 %v1744_v13 }
 0x1c2   : > { %v687_v32 = vpop.xlane.xlu0 %686 }
 0x1c3   : > { %v698_v33 = vmul.f32 0.00390625, %v687_v32  ;;  %v775_v32 = vrot.slane %v770_v27, %v2211_v7 }
 0x1c5   : > { %v2220_v34 = vsub.f32 %v667_v14, %v698_v33  ;;  %v2222_v35 = vsub.f32 %v669_v15, %v698_v33  ;;  %v779_v33 = vrot.slane %v770_v27, %v2213_v8 }
 0x1c6   : > { %v690_v36 = vpop.xlane.xlu0 %689 }
 0x1c7   : > { %v699_v37 = vmul.f32 0.00390625, %v690_v36  ;;  %v710_v38 = vmul.f32 %v2220_v34, %v2220_v34  ;;  %v711_v39 = vmul.f32 %v2222_v35, %v2222_v35 }
 0x1c9   : > { %v2228_v40 = vsub.f32 %v671_v19, %v699_v37  ;;  %v2230_v41 = vsub.f32 %v673_v20, %v699_v37  ;;  %v718_v42 = vadd.f32 %v711_v39, %v710_v38 }
 0x1ca   : > { %v693_v43 = vpop.xlane.xlu1 %692 }
 0x1cb   : > { %v700_v44 = vmul.f32 0.00390625, %v693_v43  ;;  %719 = vadd.xlane.f32.xlu0 %v718_v42  ;;  %v712_v45 = vmul.f32 %v2228_v40, %v2228_v40  ;;  %v713_v46 = vmul.f32 %v2230_v41, %v2230_v41 }
 0x1cd   : > { %v2236_v47 = vsub.f32 %v677_v24, %v700_v44  ;;  %v2238_v48 = vsub.f32 %v679_v25, %v700_v44  ;;  %v721_v49 = vadd.f32 %v713_v46, %v712_v45  ;;  %v750_v25 = vld [vmem:[%s2374_s3] sm:$0x3] }
 0x1ce   : > { %v696_v50 = vpop.xlane.xlu1 %695  ;;  %v755_v28 = vrot.slane %v750_v25, %v2211_v7 }
 0x1cf   : > { %v701_v51 = vmul.f32 0.00390625, %v696_v50  ;;  %722 = vadd.xlane.f32.xlu1 %v721_v49  ;;  %v714_v52 = vmul.f32 %v2236_v47, %v2236_v47  ;;  %v715_v53 = vmul.f32 %v2238_v48, %v2238_v48 }
 0x1d1   : > { %v2244_v54 = vsub.f32 %v681_v29, %v701_v51  ;;  %v2246_v55 = vsub.f32 %v683_v30, %v701_v51  ;;  %v724_v56 = vadd.f32 %v715_v53, %v714_v52  ;;  %v759_v29 = vrot.slane %v750_v25, %v2213_v8 }
 0x1d3   : > { %725 = vadd.xlane.f32.xlu0 %v724_v56  ;;  %v716_v57 = vmul.f32 %v2244_v54, %v2244_v54  ;;  %v717_v58 = vmul.f32 %v2246_v55, %v2246_v55 }
 0x1d5   : > { %v727_v59 = vadd.f32 %v717_v58, %v716_v57 }
 0x1d7   : > { %728 = vadd.xlane.f32.xlu1 %v727_v59 }
 0x254   : > { %v720_v14 = vpop.xlane.xlu0 %719 }
 0x255   : > { %v730_v15 = vmul.f32 0.00390625, %v720_v14 }
 0x257   : > { %v734_v16 = vadd.f32 1e-05, %v730_v15 }
 0x258   : > { %v723_v17 = vpop.xlane.xlu1 %722 }
 0x259   : > { %1757 = vrsqrt.f32 %v734_v16  ;;  %v731_v18 = vmul.f32 0.00390625, %v723_v17 }
 0x25b   : > { %v735_v19 = vadd.f32 1e-05, %v731_v18  ;;  %v1529_v18 = vld [vmem:[%s2377_s6] ss:$0 sm:$0xff] }
 0x25c   : > { %v726_v20 = vpop.xlane.xlu0 %725 }
 0x25d   : > { %1759 = vrsqrt.f32 %v735_v19  ;;  %v732_v21 = vmul.f32 0.00390625, %v726_v20 }
 0x25f   : > { %v736_v22 = vadd.f32 1e-05, %v732_v21 }
 0x260   : > { %v729_v23 = vpop.xlane.xlu1 %728 }
 0x261   : > { %1761 = vrsqrt.f32 %v736_v22  ;;  %v733_v24 = vmul.f32 0.00390625, %v729_v23 }
 0x263   : > { %v737_v26 = vadd.f32 1e-05, %v733_v24 }
 0x265   : > { %1763 = vrsqrt.f32 %v737_v26 }
 0x266   : > { %v1758_v30 = vpop.eup %1757 }
 0x267   : > { %v743_v31 = vmul.f32 %v1758_v30, %v2222_v35  ;;  %v742_v36 = vmul.f32 %v1758_v30, %v2220_v34 }
 0x269   : > { %v763_v37 = vmul.f32 %v759_v29, %v743_v31  ;;  %v762_v38 = vmul.f32 %v755_v28, %v742_v36 }
 0x26a   : > { %v1760_v39 = vpop.eup %1759 }
 0x26b   : > { %v745_v42 = vmul.f32 %v1760_v39, %v2230_v41  ;;  %v783_v43 = vadd.f32 %v779_v33, %v763_v37  ;;  %v744_v44 = vmul.f32 %v1760_v39, %v2228_v40  ;;  %v782_v45 = vadd.f32 %v775_v32, %v762_v38 }
 0x26d   : > { %v765_v46 = vmul.f32 %v759_v29, %v745_v42  ;;  %v764_v49 = vmul.f32 %v755_v28, %v744_v44  ;;  %v791_v51 = vmul.f32 0.01, %v783_v43  ;;  %v790_v35 = vmul.f32 0.01, %v782_v45 }
 0x26e   : > { %v1762_v50 = vpop.eup %1761 }
 0x26f   : > { %v785_v52 = vadd.f32 %v779_v33, %v765_v46  ;;  %v784_v7 = vadd.f32 %v775_v32, %v764_v49  ;;  %v747_v8 = vmul.f32 %v1762_v50, %v2238_v48  ;;  %v746_v34 = vmul.f32 %v1762_v50, %v2236_v47 }
 0x270   : > { %v799_v58 = vmax.f32 %v783_v43, %v791_v51  ;;  %v798_v41 = vmax.f32 %v782_v45, %v790_v35 }
 0x271   : > { %v793_v53 = vmul.f32 0.01, %v785_v52  ;;  %v792_v56 = vmul.f32 0.01, %v784_v7  ;;  %v767_v59 = vmul.f32 %v759_v29, %v747_v8  ;;  %v766_v60 = vmul.f32 %v755_v28, %v746_v34  ;;  %v1745_v8 = vld [vmem:[%s2380_s9 + $0x38] sm:$0xff]   ;;  %v1746_v34 = vld [vmem:[%s2380_s9 + $0x30] sm:$0xff]  }
 0x272   : > { %v1764_v57 = vpop.eup %1763  ;;  %1612 = vmatprep.subr.bf16.mxu0 %v1745_v8 }
 0x273   : > { %v801_v40 = vmax.f32 %v785_v52, %v793_v53  ;;  %v800_v61 = vmax.f32 %v784_v7, %v792_v56  ;;  %v749_v62 = vmul.f32 %v1764_v57, %v2246_v55  ;;  %v748_v63 = vmul.f32 %v1764_v57, %v2244_v54  ;;  %1613 = vmatpush3.bf16.msra.mxu0 %v1745_v8  ;;  %v1747_v53 = vld [vmem:[%s2380_s9 + $0x28] sm:$0xff]   ;;  %v1748_v56 = vld [vmem:[%s2380_s9 + $0x20] sm:$0xff]   ;;  %v1749_v57 = vld [vmem:[%s2380_s9 + $0x18] sm:$0xff]  }
 0x274   : > { %v787_v0 = vadd.f32 %v779_v33, %v767_v59  ;;  %v786_v1 = vadd.f32 %v775_v32, %v766_v60  ;;  %1614 = vmatprep.subr.bf16.mxu0 %v1746_v34  ;;  %v1752_v59 = vld [vmem:[%s2380_s9] sm:$0xff]  }
 0x275   : > { %v807_v2 = vpack.c.bf16 %v801_v40, %v799_v58  ;;  %v806_v3 = vpack.c.bf16 %v800_v61, %v798_v41  ;;  %v769_v48 = vmul.f32 %v759_v29, %v749_v62  ;;  %v768_v4 = vmul.f32 %v755_v28, %v748_v63  ;;  %v1750_v58 = vld [vmem:[%s2380_s9 + $0x10] sm:$0xff]   ;;  %v1751_v41 = vld [vmem:[%s2380_s9 + $0x8] sm:$0xff]  }
 0x276   : > { %v795_v5 = vmul.f32 0.01, %v787_v0  ;;  %v794_v9 = vmul.f32 0.01, %v786_v1 }
 0x277   : > { %977 = vmatprep.mubr.bf16.mxu1 %v807_v2  ;;  %v789_v47 = vadd.f32 %v779_v33, %v769_v48  ;;  %v788_v6 = vadd.f32 %v775_v32, %v768_v4  ;;  %1615 = vmatpush3.bf16.msra.mxu0 %v1746_v34 }
 0x278   : > { %978 = vmatmul.mubr.bf16.vlgmr.msra.gmra.mxu1 %v806_v3  ;;  %v803_v12 = vmax.f32 %v787_v0, %v795_v5  ;;  %v802_v14 = vmax.f32 %v786_v1, %v794_v9  ;;  %1616 = vmatprep.subr.bf16.mxu0 %v1747_v53 }
 0x279   : > { %v797_v10 = vmul.f32 0.01, %v789_v47  ;;  %v796_v11 = vmul.f32 0.01, %v788_v6 }
 0x27b   : > { %v805_v13 = vmax.f32 %v789_v47, %v797_v10  ;;  %v804_v55 = vmax.f32 %v788_v6, %v796_v11  ;;  %1617 = vmatpush3.bf16.msra.mxu0 %v1747_v53  ;;  %v1546_v6 = vld [vmem:[#allocation4] ss:$0 sm:$0xff]  ;;  %v1547_v10 = vld [vmem:[#allocation6] ss:$0 sm:$0xff] }
 0x27c   : > { %1618 = vmatprep.subr.bf16.mxu0 %v1748_v56 }
 0x27d   : > { %v809_v15 = vpack.c.bf16 %v805_v13, %v803_v12  ;;  %v808_v54 = vpack.c.bf16 %v804_v55, %v802_v14 }
 0x27f   : > { %985 = vmatprep.mubr.bf16.mxu1 %v809_v15  ;;  %1619 = vmatpush3.bf16.msra.mxu0 %v1748_v56 }
 0x280   : > { %986 = vmatmul.mubr.bf16.gmra.mxu1 %v808_v54  ;;  %1620 = vmatprep.subr.bf16.mxu0 %v1749_v57 }
 0x283   : > { %1621 = vmatpush3.bf16.msra.mxu0 %v1749_v57 }
 0x284   : > { %1622 = vmatprep.subr.bf16.mxu0 %v1750_v58 }
 0x287   : > { %1623 = vmatpush3.bf16.msra.mxu0 %v1750_v58 }
 0x288   : > { %1624 = vmatprep.subr.bf16.mxu0 %v1751_v41 }
 0x28b   : > { %1625 = vmatpush3.bf16.msra.mxu0 %v1751_v41 }
 0x28c   : > { %1626 = vmatprep.subr.bf16.mxu0 %v1752_v59 }
 0x28f   : > { %1627 = vmatpush3.bf16.msra.mxu0 %v1752_v59 }
 0x338   : > { %v1584_v16 = vpop.f32.mrf.mxu1 }
 0x33a   : > { %v1585_v17 = vpop.f32.mrf.mxu1 }
 0x33b   : > { %v1586_v19 = vadd.f32 %v1585_v17, %v1584_v16 }
 0x33c   : > { %v1587_v20 = vpop.f32.mrf.mxu1 }
 0x33d   : > { %v980_v21 = vadd.f32 %v1586_v19, %v1529_v18 }
 0x33e   : > { %v1588_v22 = vpop.f32.mrf.mxu1 }
 0x33f   : > { %v1589_v23 = vadd.f32 %v1588_v22, %v1587_v20  ;;  %994 = vadd.xlane.f32.xlu0 %v980_v21 }
 0x340   : > { %v1590_v24 = vpop.f32.mrf.mxu1 }
 0x341   : > { %v983_v25 = vadd.f32 %v1589_v23, %v1529_v18 }
 0x342   : > { %v1591_v26 = vpop.f32.mrf.mxu1 }
 0x343   : > { %v1592_v27 = vadd.f32 %v1591_v26, %v1590_v24  ;;  %996 = vadd.xlane.f32.xlu1 %v983_v25 }
 0x344   : > { %v1593_v28 = vpop.f32.mrf.mxu1 }
 0x345   : > { %v988_v29 = vadd.f32 %v1592_v27, %v1529_v18 }
 0x346   : > { %v1594_v30 = vpop.f32.mrf.mxu1 }
 0x347   : > { %v1595_v31 = vadd.f32 %v1594_v30, %v1593_v28  ;;  %998 = vadd.xlane.f32.xlu0 %v988_v29 }
 0x349   : > { %v991_v32 = vadd.f32 %v1595_v31, %v1529_v18 }
 0x34b   : > { %1000 = vadd.xlane.f32.xlu1 %v991_v32 }
 0x3c8   : > { %v995_v33 = vpop.xlane.xlu0 %994 }
 0x3c9   : > { %v1003_v36 = vmul.f32 0.0078125, %v995_v33 }
 0x3cb   : > { %v1007_v37 = vsub.f32 %v980_v21, %v1003_v36  ;;  %v1548_v36 = vld [vmem:[#allocation7] ss:$0 sm:$0xff] }
 0x3cc   : > { %v997_v38 = vpop.xlane.xlu1 %996 }
 0x3cd   : > { %v1004_v39 = vmul.f32 0.0078125, %v997_v38  ;;  %v1011_v42 = vmul.f32 %v1007_v37, %v1007_v37 }
 0x3cf   : > { %v1008_v43 = vsub.f32 %v983_v25, %v1004_v39  ;;  %1015 = vadd.xlane.f32.xlu0 %v1011_v42 }
 0x3d0   : > { %v999_v44 = vpop.xlane.xlu0 %998 }
 0x3d1   : > { %v1005_v45 = vmul.f32 0.0078125, %v999_v44  ;;  %v1012_v46 = vmul.f32 %v1008_v43, %v1008_v43 }
 0x3d3   : > { %v1009_v49 = vsub.f32 %v988_v29, %v1005_v45  ;;  %1017 = vadd.xlane.f32.xlu1 %v1012_v46 }
 0x3d4   : > { %v1001_v50 = vpop.xlane.xlu1 %1000 }
 0x3d5   : > { %v1006_v51 = vmul.f32 0.0078125, %v1001_v50  ;;  %v1013_v35 = vmul.f32 %v1009_v49, %v1009_v49 }
 0x3d7   : > { %v1010_v52 = vsub.f32 %v991_v32, %v1006_v51  ;;  %1019 = vadd.xlane.f32.xlu0 %v1013_v35 }
 0x3d9   : > { %v1014_v7 = vmul.f32 %v1010_v52, %v1010_v52 }
 0x3db   : > { %1021 = vadd.xlane.f32.xlu1 %v1014_v7 }
 0x458   : > { %v1016_v60 = vpop.xlane.xlu0 %1015 }
 0x459   : > { %v1023_v40 = vmul.f32 0.0078125, %v1016_v60 }
 0x45b   : > { %v1027_v61 = vadd.f32 1e-05, %v1023_v40 }
 0x45c   : > { %v1018_v62 = vpop.xlane.xlu1 %1017 }
 0x45d   : > { %1765 = vrsqrt.f32 %v1027_v61  ;;  %v1024_v63 = vmul.f32 0.0078125, %v1018_v62 }
 0x45f   : > { %v1028_v0 = vadd.f32 1e-05, %v1024_v63 }
 0x460   : > { %v1020_v1 = vpop.xlane.xlu0 %1019 }
 0x461   : > { %1767 = vrsqrt.f32 %v1028_v0  ;;  %v1025_v2 = vmul.f32 0.0078125, %v1020_v1 }
 0x463   : > { %v1029_v3 = vadd.f32 1e-05, %v1025_v2 }
 0x464   : > { %v1022_v48 = vpop.xlane.xlu1 %1021 }
 0x465   : > { %1769 = vrsqrt.f32 %v1029_v3  ;;  %v1026_v4 = vmul.f32 0.0078125, %v1022_v48  ;;  %v1753_v48 = vld [vmem:[%s2384_s13 + $0x18] sm:$0xff]  }
 0x466   : > { %1632 = vmatprep.subr.bf16.mxu1 %v1753_v48 }
 0x467   : > { %v1030_v47 = vadd.f32 1e-05, %v1026_v4  ;;  %1633 = vmatpush3.bf16.msra.mxu1 %v1753_v48  ;;  %v1754_v4 = vld [vmem:[%s2384_s13 + $0x10] sm:$0xff]  }
 0x468   : > { %1634 = vmatprep.subr.bf16.mxu1 %v1754_v4 }
 0x469   : > { %1771 = vrsqrt.f32 %v1030_v47  ;;  %v1755_v47 = vld [vmem:[%s2384_s13 + $0x8] sm:$0xff]  }
 0x46a   : > { %v1766_v5 = vpop.eup %1765 }
 0x46b   : > { %v1035_v9 = vmul.f32 %v1766_v5, %v1007_v37  ;;  %1635 = vmatpush3.bf16.msra.mxu1 %v1754_v4  ;;  %v1756_v5 = vld [vmem:[%s2384_s13] sm:$0xff]  }
 0x46c   : > { %1636 = vmatprep.subr.bf16.mxu1 %v1755_v47 }
 0x46d   : > { %v1046_v11 = vmul.f32 %v1546_v6, %v1035_v9 }
 0x46e   : > { %v1768_v12 = vpop.eup %1767 }
 0x46f   : > { %v1036_v13 = vmul.f32 %v1768_v12, %v1008_v43  ;;  %v1057_v14 = vadd.f32 %v1547_v10, %v1046_v11  ;;  %1637 = vmatpush3.bf16.msra.mxu1 %v1755_v47 }
 0x470   : > { %1638 = vmatprep.subr.bf16.mxu1 %v1756_v5 }
 0x471   : > { %v1047_v55 = vmul.f32 %v1546_v6, %v1036_v13  ;;  %v1061_v17 = vmul.f32 0.01, %v1057_v14 }
 0x472   : > { %v1770_v15 = vpop.eup %1769 }
 0x473   : > { %v1037_v54 = vmul.f32 %v1770_v15, %v1009_v49  ;;  %v1058_v16 = vadd.f32 %v1547_v10, %v1047_v55  ;;  %v1065_v22 = vmax.f32 %v1057_v14, %v1061_v17  ;;  %1639 = vmatpush3.bf16.msra.mxu1 %v1756_v5 }
 0x475   : > { %v1062_v18 = vmul.f32 0.01, %v1058_v16  ;;  %v1048_v19 = vmul.f32 %v1546_v6, %v1037_v54 }
 0x476   : > { %v1772_v20 = vpop.eup %1771 }
 0x477   : > { %v1038_v21 = vmul.f32 %v1772_v20, %v1010_v52  ;;  %v1066_v23 = vmax.f32 %v1058_v16, %v1062_v18  ;;  %v1059_v24 = vadd.f32 %v1547_v10, %v1048_v19  ;;  %v1557_v19 = vld [vmem:[#allocation9] ss:$0 sm:$0xff] }
 0x479   : > { %v1069_v25 = vpack.c.bf16 %v1066_v23, %v1065_v22  ;;  %v1049_v26 = vmul.f32 %v1546_v6, %v1038_v21  ;;  %v1063_v28 = vmul.f32 0.01, %v1059_v24  ;;  %v1558_v21 = vld [vmem:[#allocation10] ss:$0 sm:$0xff] }
 0x47b   : > { %1628 = vmatprep.mubr.bf16.mxu0 %v1069_v25  ;;  %v1060_v27 = vadd.f32 %v1547_v10, %v1049_v26  ;;  %v1067_v30 = vmax.f32 %v1059_v24, %v1063_v28 }
 0x47d   : > { %v1064_v29 = vmul.f32 0.01, %v1060_v27 }
 0x47f   : > { %v1068_v31 = vmax.f32 %v1060_v27, %v1064_v29 }
 0x481   : > { %v1070_v32 = vpack.c.bf16 %v1068_v31, %v1067_v30 }
 0x483   : > { %1629 = vmatmul.mubr.bf16.vlgmr.msra.gmra.mxu0 %v1070_v32 }
 0x543   : > { %v1630_v33 = vpop.f32.mrf.mxu0 }
 0x544   : > { %v1185_v42 = vadd.f32 %v1630_v33, %v1548_v36 }
 0x545   : > { %v1176_v37 = vpop.f32.mrf.mxu0 }
 0x546   : > { %v1177_v38 = vadd.f32 %v1548_v36, %v1176_v37  ;;  %v1198_v50 = vsel %vm1191_vm1, %v1185_v42, 0.0 }
 0x547   : > { %v1631_v39 = vpop.f32.mrf.mxu0 }
 0x548   : > { %v1192_v43 = vsel %vm1191_vm1, %v1177_v38, 0.0  ;;  %v1188_v46 = vadd.f32 %v1631_v39, %v1548_v36 }
 0x549   : > { %v1179_v44 = vpop.f32.mrf.mxu0  ;;  %1193 = vadd.xlane.f32.xlu0 %v1192_v43 }
 0x54a   : > { %v1180_v45 = vadd.f32 %v1548_v36, %v1179_v44  ;;  %v1201_v51 = vsel %vm1191_vm1, %v1188_v46, 0.0 }
 0x54c   : > { %v1195_v49 = vsel %vm1191_vm1, %v1180_v45, 0.0 }
 0x54d   : > { %1196 = vadd.xlane.f32.xlu1 %v1195_v49  ;;  %1199 = vadd.xlane.f32.xlu0 %v1198_v50 }
 0x551   : > { %1202 = vadd.xlane.f32.xlu1 %v1201_v51 }
 0x5d2   : > { %v1194_v35 = vpop.xlane.xlu0 %1193 }
 0x5d3   : > { %v1205_v52 = vmul.f32 0.015625, %v1194_v35 }
 0x5d5   : > { %v1209_v7 = vsub.f32 %v1177_v38, %v1205_v52  ;;  %v1559_v52 = vld [vmem:[#allocation12] ss:$0 sm:$0xff] }
 0x5d6   : > { %v1197_v8 = vpop.xlane.xlu1 %1196  ;;  %v1200_v34 = vpop.xlane.xlu0 %1199 }
 0x5d7   : > { %v1206_v53 = vmul.f32 0.015625, %v1197_v8  ;;  %v1207_v56 = vmul.f32 0.015625, %v1200_v34  ;;  %v1213_v57 = vmul.f32 %v1209_v7, %v1209_v7 }
 0x5d9   : > { %v1210_v58 = vsub.f32 %v1180_v45, %v1206_v53  ;;  %v1211_v41 = vsub.f32 %v1185_v42, %v1207_v56  ;;  %v1217_v59 = vsel %vm1191_vm1, %v1213_v57, 0.0 }
 0x5da   : > { %v1203_v60 = vpop.xlane.xlu1 %1202  ;;  %1218 = vadd.xlane.f32.xlu0 %v1217_v59 }
 0x5db   : > { %v1208_v40 = vmul.f32 0.015625, %v1203_v60  ;;  %v1214_v61 = vmul.f32 %v1210_v58, %v1210_v58  ;;  %v1215_v62 = vmul.f32 %v1211_v41, %v1211_v41 }
 0x5dd   : > { %v1212_v63 = vsub.f32 %v1188_v46, %v1208_v40  ;;  %v1220_v0 = vsel %vm1191_vm1, %v1214_v61, 0.0  ;;  %v1223_v1 = vsel %vm1191_vm1, %v1215_v62, 0.0 }
 0x5de   : > { %1221 = vadd.xlane.f32.xlu1 %v1220_v0  ;;  %1224 = vadd.xlane.f32.xlu0 %v1223_v1 }
 0x5df   : > { %v1216_v2 = vmul.f32 %v1212_v63, %v1212_v63 }
 0x5e1   : > { %v1226_v3 = vsel %vm1191_vm1, %v1216_v2, 0.0 }
 0x5e2   : > { %1227 = vadd.xlane.f32.xlu1 %v1226_v3 }
 0x663   : > { %v1219_v6 = vpop.xlane.xlu0 %1218 }
 0x664   : > { %v1229_v9 = vmul.f32 0.015625, %v1219_v6 }
 0x666   : > { %v1233_v10 = vadd.f32 1e-05, %v1229_v9 }
 0x667   : > { %v1222_v11 = vpop.xlane.xlu1 %1221  ;;  %v1225_v12 = vpop.xlane.xlu0 %1224 }
 0x668   : > { %1773 = vrsqrt.f32 %v1233_v10  ;;  %v1230_v13 = vmul.f32 0.015625, %v1222_v11  ;;  %v1231_v14 = vmul.f32 0.015625, %v1225_v12 }
 0x66a   : > { %v1234_v55 = vadd.f32 1e-05, %v1230_v13  ;;  %v1235_v15 = vadd.f32 1e-05, %v1231_v14 }
 0x66b   : > { %v1228_v54 = vpop.xlane.xlu1 %1227 }
 0x66c   : > { %1775 = vrsqrt.f32 %v1234_v55  ;;  %v1232_v16 = vmul.f32 0.015625, %v1228_v54 }
 0x66d   : > { %1777 = vrsqrt.f32 %v1235_v15 }
 0x66e   : > { %v1236_v17 = vadd.f32 1e-05, %v1232_v16 }
 0x670   : > { %1779 = vrsqrt.f32 %v1236_v17 }
 0x675   : > { %v1774_v18 = vpop.eup %1773 }
 0x676   : > { %v1241_v20 = vmul.f32 %v1774_v18, %v1209_v7 }
 0x678   : > { %v1252_v22 = vmul.f32 %v1557_v19, %v1241_v20 }
 0x679   : > { %v1776_v23 = vpop.eup %1775 }
 0x67a   : > { %v1778_v24 = vpop.eup %1777  ;;  %v1242_v25 = vmul.f32 %v1776_v23, %v1210_v58  ;;  %v1263_v26 = vadd.f32 %v1558_v21, %v1252_v22 }
 0x67b   : > { %v1243_v27 = vmul.f32 %v1778_v24, %v1211_v41 }
 0x67c   : > { %v1253_v28 = vmul.f32 %v1557_v19, %v1242_v25  ;;  %v1267_v33 = vmul.f32 0.01, %v1263_v26 }
 0x67d   : > { %v1780_v29 = vpop.eup %1779  ;;  %v1254_v30 = vmul.f32 %v1557_v19, %v1243_v27 }
 0x67e   : > { %v1244_v31 = vmul.f32 %v1780_v29, %v1212_v63  ;;  %v1264_v32 = vadd.f32 %v1558_v21, %v1253_v28  ;;  %v1271_v42 = vmax.f32 %v1263_v26, %v1267_v33 }
 0x67f   : > { %v1265_v36 = vadd.f32 %v1558_v21, %v1254_v30 }
 0x680   : > { %v1255_v37 = vmul.f32 %v1557_v19, %v1244_v31  ;;  %v1268_v38 = vmul.f32 0.01, %v1264_v32 }
 0x681   : > { %v1269_v44 = vmul.f32 0.01, %v1265_v36 }
 0x682   : > { %v1266_v39 = vadd.f32 %v1558_v21, %v1255_v37  ;;  %v1272_v43 = vmax.f32 %v1264_v32, %v1268_v38 }
 0x683   : > { %v1273_v49 = vmax.f32 %v1265_v36, %v1269_v44 }
 0x684   : > { %v1275_v45 = vpack.c.bf16 %v1272_v43, %v1271_v42  ;;  %v1270_v46 = vmul.f32 0.01, %v1266_v39 }
 0x686   : > { %1640 = vmatprep.mubr.msk.bf16.mxu1 %vm1191_vm1, %v1275_v45  ;;  %v1274_v50 = vmax.f32 %v1266_v39, %v1270_v46 }
 0x688   : > { %v1276_v51 = vpack.c.bf16 %v1274_v50, %v1273_v49 }
 0x68a   : > { %1641 = vmatmul.mubr.msk.bf16.vlgmr.msra.gmra.mxu1 %vm1191_vm1, %v1276_v51 }
 0x74a   : > { %v1642_v35 = vpop.f32.mrf.mxu1 }
 0x74b   : > { %v1365_v57 = vadd.f32 %v1642_v35, %v1559_v52 }
 0x74c   : > { %v1356_v7 = vpop.f32.mrf.mxu1 }
 0x74d   : > { %v1357_v8 = vadd.f32 %v1559_v52, %v1356_v7  ;;  %1373 = vst [vmem:[%s584_s21 + $0x10] sm:$0xff] %v1365_v57 }
 0x74e   : > { %v1643_v34 = vpop.f32.mrf.mxu1 }
 0x74f   : > { %1371 = vst [vmem:[%s584_s21] sm:$0xff] %v1357_v8  ;;  %v1368_v58 = vadd.f32 %v1643_v34, %v1559_v52 }
 0x750   : > { %v1359_v53 = vpop.f32.mrf.mxu1 }
 0x751   : > { %v1360_v56 = vadd.f32 %v1559_v52, %v1359_v53  ;;  %1374 = vst [vmem:[%s584_s21 + $0x18] sm:$0xff] %v1368_v58 }
 0x753   : > { %1372 = vst [vmem:[%s584_s21 + $0x8] sm:$0xff] %v1360_v56 }
 0x754 PF: > { %s29_s18 = sadd.s32 1, %s1985_s18  }
 0x755   : > { %p26_p5 = scmp.ge.s32.totalorder %s29_s18, 4  }
 0x757   :  { %28 = sbr.rel (!%p26_p5) target bundleno = 4 (0x4), region = 139 }
 0x75c   :  { %1397 = vsyncpa [#allocation3], 1 }
 0x75d   :  { %1399 = vsyncpa [#allocation3 + $0x1], 1 }
 0x75e   :  { %1400 = vsyncpa [#allocation5], 1 }
 0x75f   :  { %1401 = vsyncpa [#allocation8], 1 }
 0x760   :  { %1402 = vsyncpa [#allocation11], 1 }

</bundles_post_ra>
